<compile_context>
chip_gen: v6e
topology: v6e:2x2x1
jax: 0.10.0
libtpu: 0.0.40
codegen_flags: <defaults>
</compile_context>

<pallas_src>
import jax
import jax.numpy as jnp
import numpy as np
from jax.experimental import pallas as pl
from jax.experimental.pallas import tpu as pltpu


def _round_up(x, m):
    return ((x + m - 1) // m) * m


# ----------------------------------------------------------------------------
# Kernel
# ----------------------------------------------------------------------------
def _kr_kernel(
    x4_ref,            # (tb, c4p)  cat(I_t, I_extk, H_i, H_extk), lane-padded
    q_ref,             # (tb, r3p)  Q in lanes [0,h), zeros elsewhere (f32)
    wg_ref, bg_ref,    # (c4p, c4p), (1, c4p)   block-diag gate weight / bias
    wp_ref, bp_ref,    # (c4p, r3p), (1, r3p)   fused I/H projection -> lanes [h,3h)
    wr_ref, br_ref,    # (r3p, r3p), (1, r3p)   retrieval gate
    wf_ref, bf_ref,    # (r3p, hp),  (1, hp)    final projection
    out_ref,           # (tb, hp)
):
    f32 = jnp.float32
    mm = wg_ref.dtype            # matmul operand dtype (f32 or bf16)

    # --- fused image + history gate paths (one gate dot, one projection dot)
    x4 = x4_ref[...]
    x4_f = x4.astype(f32)
    gate = jax.nn.sigmoid(
        jnp.dot(x4, wg_ref[...], preferred_element_type=f32) + bg_ref[...]
    )
    gated = (gate * x4_f).astype(mm)
    proj = jnp.dot(gated, wp_ref[...], preferred_element_type=f32) + bp_ref[...]

    # --- cat(Q, I, H) via disjoint-lane VPU add (no concatenate / relayout)
    cat_r = proj + q_ref[...].astype(f32)

    # --- retrieval gate + final projection on the tight 3h slab
    gate_r = jax.nn.sigmoid(
        jnp.dot(cat_r.astype(mm), wr_ref[...], preferred_element_type=f32)
        + br_ref[...]
    )
    gated_r = (gate_r * cat_r).astype(mm)
    out_ref[...] = (
        jnp.dot(gated_r, wf_ref[...], preferred_element_type=f32) + bf_ref[...]
    ).astype(out_ref.dtype)


# ----------------------------------------------------------------------------
# One-time weight packing (host-side numpy, NOT per forward call)
# ----------------------------------------------------------------------------
def prepare_kr_weights(params, h, matmul_dtype=jnp.float32):
    c4 = 4 * h
    r3 = 3 * h
    c4p = _round_up(c4, 128)
    r3p = _round_up(r3, 128)
    hp = _round_up(h, 128)

    def npf(x):
        return np.asarray(x, dtype=np.float32)

    Wi, bi = params["w_i"]
    Wh, bh = params["w_h"]
    Wr, br = params["w_r"]
    Wif, bif = params["w_i_final"]
    Whf, bhf = params["w_h_final"]
    Wf, bf = params["w_final"]

    # Block-diagonal gate weight acting on cat_i || cat_h.
    Wg = np.zeros((c4p, c4p), np.float32)
    Wg[0:2 * h, 0:2 * h] = npf(Wi).T
    Wg[2 * h:4 * h, 2 * h:4 * h] = npf(Wh).T
    bg = np.zeros((1, c4p), np.float32)
    bg[0, 0:2 * h] = npf(bi)
    bg[0, 2 * h:4 * h] = npf(bh)

    # Fused projection: image output -> lanes [h,2h), history -> [2h,3h).
    # Columns [0,h) stay zero so Q (added afterwards) owns those lanes.
    Wp = np.zeros((c4p, r3p), np.float32)
    Wp[0:2 * h, h:2 * h] = npf(Wif).T
    Wp[2 * h:4 * h, 2 * h:3 * h] = npf(Whf).T
    bp = np.zeros((1, r3p), np.float32)
    bp[0, h:2 * h] = npf(bif)
    bp[0, 2 * h:3 * h] = npf(bhf)

    # Retrieval gate / final projection on the tight 3h slab.
    Wrp = np.zeros((r3p, r3p), np.float32)
    Wrp[0:3 * h, 0:3 * h] = npf(Wr).T
    brp = np.zeros((1, r3p), np.float32)
    brp[0, 0:3 * h] = npf(br)

    Wfp = np.zeros((r3p, hp), np.float32)
    Wfp[0:3 * h, 0:h] = npf(Wf).T
    bfp = np.zeros((1, hp), np.float32)
    bfp[0, 0:h] = npf(bf)

    mm = matmul_dtype
    return {
        "h": h, "c4p": c4p, "r3p": r3p, "hp": hp, "matmul_dtype": mm,
        "Wg": jnp.asarray(Wg, mm), "bg": jnp.asarray(bg, jnp.float32),
        "Wp": jnp.asarray(Wp, mm), "bp": jnp.asarray(bp, jnp.float32),
        "Wr": jnp.asarray(Wrp, mm), "br": jnp.asarray(brp, jnp.float32),
        "Wf": jnp.asarray(Wfp, mm), "bf": jnp.asarray(bfp, jnp.float32),
    }


# ----------------------------------------------------------------------------
# Forward wrapper
# ----------------------------------------------------------------------------
def knowledge_retrieval_pallas(I_t, I_extk, H_i, H_extk, Q, packed, tb_max=512):
    f32 = jnp.float32
    h = packed["h"]
    c4p, r3p, hp = packed["c4p"], packed["r3p"], packed["hp"]
    mm = packed["matmul_dtype"]
    B = Q.shape[0]

    # Batch tiling: tile capped at tb_max (128 MiB VMEM on v5e/v6e easily holds
    # 512-row double-buffered tiles), >=2 grid steps for v7x's two TensorCores
    # when B is large enough, and the tile tracks B to minimize padding waste.
    min_steps = 2 if B >= 16 else 1
    n_steps = max(pl.cdiv(B, tb_max), min_steps)
    tb = _round_up(pl.cdiv(B, n_steps), 8)
    Bp = n_steps * tb

    # Single concatenate builds the (lane-padded) gate-stage slab directly.
    pieces = [I_t.astype(f32), I_extk.astype(f32),
              H_i.astype(f32), H_extk.astype(f32)]
    lane_fill = c4p - 4 * h
    if lane_fill:
        pieces.append(jnp.zeros((B, lane_fill), f32))
    x4 = jnp.concatenate(pieces, axis=-1).astype(mm)

    q_fill = r3p - h
    if q_fill:
        qp = jnp.concatenate([Q.astype(f32), jnp.zeros((B, q_fill), f32)], axis=-1)
    else:
        qp = Q.astype(f32)

    if Bp > B:
        x4 = jnp.pad(x4, ((0, Bp - B), (0, 0)))
        qp = jnp.pad(qp, ((0, Bp - B), (0, 0)))

    weights = [packed["Wg"], packed["bg"], packed["Wp"], packed["bp"],
               packed["Wr"], packed["br"], packed["Wf"], packed["bf"]]

    def act_spec(width):
        return pl.BlockSpec((tb, width), lambda i: (i, 0))

    def const_spec(a):
        # Full-array block, constant index map -> loaded once, kept resident.
        return pl.BlockSpec(a.shape, lambda i: (0, 0))

    in_specs = [act_spec(c4p), act_spec(r3p)] + [const_spec(w) for w in weights]

    out = pl.pallas_call(
        _kr_kernel,
        out_shape=jax.ShapeDtypeStruct((Bp, hp), f32),
        grid_spec=pltpu.PrefetchScalarGridSpec(
            num_scalar_prefetch=0,
            grid=(n_steps,),
            in_specs=in_specs,
            out_specs=pl.BlockSpec((tb, hp), lambda i: (i, 0)),
        ),
        compiler_params=pltpu.CompilerParams(
            dimension_semantics=("parallel",),
        ),
    )(x4, qp, *weights)

    return out[:B, :h]


# ----------------------------------------------------------------------------
# Pure-JAX reference
# ----------------------------------------------------------------------------
def knowledge_retrieval_ref(I_t, I_extk, H_i, H_extk, Q, params):
    def lin(x, wb):
        W, b = wb
        return x @ W.T + b

    cat_i = jnp.concatenate([I_t, I_extk], axis=-1)
    gate_i = jax.nn.sigmoid(lin(cat_i, params["w_i"]))
    I = lin(gate_i * cat_i, params["w_i_final"])

    cat_h = jnp.concatenate([H_i, H_extk], axis=-1)
    gate_h = jax.nn.sigmoid(lin(cat_h, params["w_h"]))
    H = lin(gate_h * cat_h, params["w_h_final"])

    cat_r = jnp.concatenate([Q, I, H], axis=-1)
    gate_r = jax.nn.sigmoid(lin(cat_r, params["w_r"]))
    K = lin(gate_r * cat_r, params["w_final"])
    return K


def make_params(key, h):
    """Deterministic synthetic parameters matching the module's Linear shapes."""
    names_shapes = {
        "w_i": (2 * h, 2 * h),
        "w_h": (2 * h, 2 * h),
        "w_r": (3 * h, 3 * h),
        "w_i_final": (h, 2 * h),
        "w_h_final": (h, 2 * h),
        "w_final": (h, 3 * h),
    }
    params = {}
    for name, (out_f, in_f) in names_shapes.items():
        key, kw, kb = jax.random.split(key, 3)
        W = 0.1 * jax.random.normal(kw, (out_f, in_f), dtype=jnp.float32)
        b = 0.1 * jax.random.normal(kb, (out_f,), dtype=jnp.float32)
        params[name] = (W, b)
    return params


if __name__ == "__main__":
    h = 32  # lstm_hidden_size

    key = jax.random.PRNGKey(0)
    key, kp = jax.random.split(key)
    params = make_params(kp, h)

    # Weight packing happens ONCE (init-time), not per forward call.
    packed_f32 = prepare_kr_weights(params, h, matmul_dtype=jnp.float32)
    packed_bf16 = prepare_kr_weights(params, h, matmul_dtype=jnp.bfloat16)

    def make_inputs(key, B):
        ks = jax.random.split(key, 5)
        return tuple(jax.random.normal(k, (B, h), dtype=jnp.float32) for k in ks)

    # Case 1: small batch (single grid step), f32 MXU path, tight tolerance.
    key, k1 = jax.random.split(key)
    inp = make_inputs(k1, 8)
    out = jax.block_until_ready(knowledge_retrieval_pallas(*inp, packed_f32))
    ref = knowledge_retrieval_ref(*inp, params)
    np.testing.assert_allclose(np.asarray(out), np.asarray(ref),
                               rtol=1e-5, atol=1e-5)

    # Case 2: batch that needs row padding + 2 grid steps (v7x dual-TC path).
    key, k2 = jax.random.split(key)
    inp2 = make_inputs(k2, 20)
    out2 = jax.block_until_ready(knowledge_retrieval_pallas(*inp2, packed_f32))
    ref2 = knowledge_retrieval_ref(*inp2, params)
    np.testing.assert_allclose(np.asarray(out2), np.asarray(ref2),
                               rtol=1e-5, atol=1e-5)

    # Case 3: bf16 MXU operands (f32 accumulation), looser tolerance.
    out3 = jax.block_until_ready(knowledge_retrieval_pallas(*inp, packed_bf16))
    np.testing.assert_allclose(np.asarray(out3), np.asarray(ref),
                               rtol=1e-1, atol=1e-1)

    print("KERNEL_OK")
</pallas_src>

<mosaic_0001>
module attributes {stable_mosaic.version = 11 : i64} {
  func.func @_kr_kernel(%arg0: i32, %arg1: memref<8x128xf32, #tpu.memory_space<vmem>>, %arg2: memref<8x128xf32, #tpu.memory_space<vmem>>, %arg3: memref<128x128xf32, #tpu.memory_space<vmem>>, %arg4: memref<1x128xf32, #tpu.memory_space<vmem>>, %arg5: memref<128x128xf32, #tpu.memory_space<vmem>>, %arg6: memref<1x128xf32, #tpu.memory_space<vmem>>, %arg7: memref<128x128xf32, #tpu.memory_space<vmem>>, %arg8: memref<1x128xf32, #tpu.memory_space<vmem>>, %arg9: memref<128x128xf32, #tpu.memory_space<vmem>>, %arg10: memref<1x128xf32, #tpu.memory_space<vmem>>, %arg11: memref<8x128xf32, #tpu.memory_space<vmem>>) attributes {dimension_semantics = [#tpu.dimension_semantics<parallel>], iteration_bounds = array<i64: 1>, scalar_prefetch = 0 : i64, scratch_operands = 0 : i64, tpu.core_type = #tpu.core_type<tc>, window_params = [{transform_indices = @transform_0, window_bounds = array<i64: 8, 128>}, {transform_indices = @transform_1, window_bounds = array<i64: 8, 128>}, {pipeline_mode = #tpu.pipeline_mode<synchronous>, transform_indices = @transform_2, window_bounds = array<i64: 128, 128>}, {pipeline_mode = #tpu.pipeline_mode<synchronous>, transform_indices = @transform_3, window_bounds = array<i64: 1, 128>}, {pipeline_mode = #tpu.pipeline_mode<synchronous>, transform_indices = @transform_4, window_bounds = array<i64: 128, 128>}, {pipeline_mode = #tpu.pipeline_mode<synchronous>, transform_indices = @transform_5, window_bounds = array<i64: 1, 128>}, {pipeline_mode = #tpu.pipeline_mode<synchronous>, transform_indices = @transform_6, window_bounds = array<i64: 128, 128>}, {pipeline_mode = #tpu.pipeline_mode<synchronous>, transform_indices = @transform_7, window_bounds = array<i64: 1, 128>}, {pipeline_mode = #tpu.pipeline_mode<synchronous>, transform_indices = @transform_8, window_bounds = array<i64: 128, 128>}, {pipeline_mode = #tpu.pipeline_mode<synchronous>, transform_indices = @transform_9, window_bounds = array<i64: 1, 128>}, {transform_indices = @transform_10, window_bounds = array<i64: 8, 128>}]} {
    %c0 = arith.constant 0 : index
    %c0_0 = arith.constant 0 : index
    %0 = vector.load %arg1[%c0, %c0_0] : memref<8x128xf32, #tpu.memory_space<vmem>>, vector<8x128xf32>
    %c0_1 = arith.constant 0 : index
    %c0_2 = arith.constant 0 : index
    %1 = vector.load %arg3[%c0_1, %c0_2] : memref<128x128xf32, #tpu.memory_space<vmem>>, vector<128x128xf32>
    %cst = arith.constant dense<0.000000e+00> : vector<8x128xf32>
    %2 = tpu.matmul %0, %1, %cst {dimension_numbers = #tpu.dot_dimension_numbers<[1], [0], [0], [1], [0, 0, 1, 1], [], []>} : vector<8x128xf32>, vector<128x128xf32>, vector<8x128xf32> -> vector<8x128xf32>
    %c0_3 = arith.constant 0 : index
    %c0_4 = arith.constant 0 : index
    %3 = vector.load %arg4[%c0_3, %c0_4] : memref<1x128xf32, #tpu.memory_space<vmem>>, vector<1x128xf32>
    %4 = vector.broadcast %3 : vector<1x128xf32> to vector<8x128xf32>
    %5 = arith.addf %2, %4 : vector<8x128xf32>
    %6 = arith.negf %5 : vector<8x128xf32>
    %7 = math.exp %6 : vector<8x128xf32>
    %cst_5 = arith.constant 1.000000e+00 : f32
    %8 = vector.broadcast %cst_5 : f32 to vector<8x128xf32>
    %9 = arith.addf %8, %7 : vector<8x128xf32>
    %10 = arith.divf %8, %9 : vector<8x128xf32>
    %11 = arith.mulf %10, %0 : vector<8x128xf32>
    %c0_6 = arith.constant 0 : index
    %c0_7 = arith.constant 0 : index
    %12 = vector.load %arg5[%c0_6, %c0_7] : memref<128x128xf32, #tpu.memory_space<vmem>>, vector<128x128xf32>
    %cst_8 = arith.constant dense<0.000000e+00> : vector<8x128xf32>
    %13 = tpu.matmul %11, %12, %cst_8 {dimension_numbers = #tpu.dot_dimension_numbers<[1], [0], [0], [1], [0, 0, 1, 1], [], []>} : vector<8x128xf32>, vector<128x128xf32>, vector<8x128xf32> -> vector<8x128xf32>
    %c0_9 = arith.constant 0 : index
    %c0_10 = arith.constant 0 : index
    %14 = vector.load %arg6[%c0_9, %c0_10] : memref<1x128xf32, #tpu.memory_space<vmem>>, vector<1x128xf32>
    %15 = vector.broadcast %14 : vector<1x128xf32> to vector<8x128xf32>
    %16 = arith.addf %13, %15 : vector<8x128xf32>
    %c0_11 = arith.constant 0 : index
    %c0_12 = arith.constant 0 : index
    %17 = vector.load %arg2[%c0_11, %c0_12] : memref<8x128xf32, #tpu.memory_space<vmem>>, vector<8x128xf32>
    %18 = arith.addf %16, %17 : vector<8x128xf32>
    %c0_13 = arith.constant 0 : index
    %c0_14 = arith.constant 0 : index
    %19 = vector.load %arg7[%c0_13, %c0_14] : memref<128x128xf32, #tpu.memory_space<vmem>>, vector<128x128xf32>
    %cst_15 = arith.constant dense<0.000000e+00> : vector<8x128xf32>
    %20 = tpu.matmul %18, %19, %cst_15 {dimension_numbers = #tpu.dot_dimension_numbers<[1], [0], [0], [1], [0, 0, 1, 1], [], []>} : vector<8x128xf32>, vector<128x128xf32>, vector<8x128xf32> -> vector<8x128xf32>
    %c0_16 = arith.constant 0 : index
    %c0_17 = arith.constant 0 : index
    %21 = vector.load %arg8[%c0_16, %c0_17] : memref<1x128xf32, #tpu.memory_space<vmem>>, vector<1x128xf32>
    %22 = vector.broadcast %21 : vector<1x128xf32> to vector<8x128xf32>
    %23 = arith.addf %20, %22 : vector<8x128xf32>
    %24 = arith.negf %23 : vector<8x128xf32>
    %25 = math.exp %24 : vector<8x128xf32>
    %cst_18 = arith.constant 1.000000e+00 : f32
    %26 = vector.broadcast %cst_18 : f32 to vector<8x128xf32>
    %27 = arith.addf %26, %25 : vector<8x128xf32>
    %28 = arith.divf %26, %27 : vector<8x128xf32>
    %29 = arith.mulf %28, %18 : vector<8x128xf32>
    %c0_19 = arith.constant 0 : index
    %c0_20 = arith.constant 0 : index
    %30 = vector.load %arg9[%c0_19, %c0_20] : memref<128x128xf32, #tpu.memory_space<vmem>>, vector<128x128xf32>
    %cst_21 = arith.constant dense<0.000000e+00> : vector<8x128xf32>
    %31 = tpu.matmul %29, %30, %cst_21 {dimension_numbers = #tpu.dot_dimension_numbers<[1], [0], [0], [1], [0, 0, 1, 1], [], []>} : vector<8x128xf32>, vector<128x128xf32>, vector<8x128xf32> -> vector<8x128xf32>
    %c0_22 = arith.constant 0 : index
    %c0_23 = arith.constant 0 : index
    %32 = vector.load %arg10[%c0_22, %c0_23] : memref<1x128xf32, #tpu.memory_space<vmem>>, vector<1x128xf32>
    %33 = vector.broadcast %32 : vector<1x128xf32> to vector<8x128xf32>
    %34 = arith.addf %31, %33 : vector<8x128xf32>
    %c0_24 = arith.constant 0 : index
    %c0_25 = arith.constant 0 : index
    %35 = vector.load %arg11[%c0_24, %c0_25] : memref<8x128xf32, #tpu.memory_space<vmem>>, vector<8x128xf32>
    tpu.vector_store %arg11[%c0_24, %c0_25], %34 {strides = array<i32>} : memref<8x128xf32, #tpu.memory_space<vmem>>, vector<8x128xf32>,
    return
  }
  func.func @transform_0(%arg0: i32) -> (i32, i32) {
    %c0_i32 = arith.constant 0 : i32
    %c0_i32_0 = arith.constant 0 : i32
    return %arg0, %c0_i32 : i32, i32
  }
  func.func @transform_1(%arg0: i32) -> (i32, i32) {
    %c0_i32 = arith.constant 0 : i32
    %c0_i32_0 = arith.constant 0 : i32
    return %arg0, %c0_i32 : i32, i32
  }
  func.func @transform_2(%arg0: i32) -> (i32, i32) {
    %c0_i32 = arith.constant 0 : i32
    %c0_i32_0 = arith.constant 0 : i32
    %c0_i32_1 = arith.constant 0 : i32
    return %c0_i32, %c0_i32_0 : i32, i32
  }
  func.func @transform_3(%arg0: i32) -> (i32, i32) {
    %c0_i32 = arith.constant 0 : i32
    %c0_i32_0 = arith.constant 0 : i32
    %c0_i32_1 = arith.constant 0 : i32
    return %c0_i32, %c0_i32_0 : i32, i32
  }
  func.func @transform_4(%arg0: i32) -> (i32, i32) {
    %c0_i32 = arith.constant 0 : i32
    %c0_i32_0 = arith.constant 0 : i32
    %c0_i32_1 = arith.constant 0 : i32
    return %c0_i32, %c0_i32_0 : i32, i32
  }
  func.func @transform_5(%arg0: i32) -> (i32, i32) {
    %c0_i32 = arith.constant 0 : i32
    %c0_i32_0 = arith.constant 0 : i32
    %c0_i32_1 = arith.constant 0 : i32
    return %c0_i32, %c0_i32_0 : i32, i32
  }
  func.func @transform_6(%arg0: i32) -> (i32, i32) {
    %c0_i32 = arith.constant 0 : i32
    %c0_i32_0 = arith.constant 0 : i32
    %c0_i32_1 = arith.constant 0 : i32
    return %c0_i32, %c0_i32_0 : i32, i32
  }
  func.func @transform_7(%arg0: i32) -> (i32, i32) {
    %c0_i32 = arith.constant 0 : i32
    %c0_i32_0 = arith.constant 0 : i32
    %c0_i32_1 = arith.constant 0 : i32
    return %c0_i32, %c0_i32_0 : i32, i32
  }
  func.func @transform_8(%arg0: i32) -> (i32, i32) {
    %c0_i32 = arith.constant 0 : i32
    %c0_i32_0 = arith.constant 0 : i32
    %c0_i32_1 = arith.constant 0 : i32
    return %c0_i32, %c0_i32_0 : i32, i32
  }
  func.func @transform_9(%arg0: i32) -> (i32, i32) {
    %c0_i32 = arith.constant 0 : i32
    %c0_i32_0 = arith.constant 0 : i32
    %c0_i32_1 = arith.constant 0 : i32
    return %c0_i32, %c0_i32_0 : i32, i32
  }
  func.func @transform_10(%arg0: i32) -> (i32, i32) {
    %c0_i32 = arith.constant 0 : i32
    %c0_i32_0 = arith.constant 0 : i32
    return %arg0, %c0_i32 : i32, i32
  }
}

</mosaic_0001>

<bundles_post_ra>
// kernel: tpu_custom_call.1
= control target key start
LH: loop header
LB: loop body
LE: loop exit
PB: predicated region body
PF: predicated region fallthrough
CT: control target
= control target key end

     0   :  { %15 = vsyncpa [#allocation3], 0  ;;  %s1092_s0 = inlined_call_operand.hbm [shape: f32[8,128], index: 0, kind: input, shape index: {}]   ;;  %s1093_s1 = inlined_call_operand.hbm [shape: f32[8,128], index: 1, kind: input, shape index: {}]   ;;  %s1094_s2 = inlined_call_operand.hbm [shape: f32[128,128], index: 2, kind: input, shape index: {}]   ;;  %s1095_s3 = inlined_call_operand.vmem [shape: f32[1,128], index: 3, kind: input, shape index: {}]   ;;  %s1096_s4 = inlined_call_operand.hbm [shape: f32[128,128], index: 4, kind: input, shape index: {}]   ;;  %s1097_s5 = inlined_call_operand.vmem [shape: f32[1,128], index: 5, kind: input, shape index: {}]   ;;  %s1098_s6 = inlined_call_operand.hbm [shape: f32[128,128], index: 6, kind: input, shape index: {}]   ;;  %s1099_s7 = inlined_call_operand.vmem [shape: f32[1,128], index: 7, kind: input, shape index: {}]   ;;  %s1100_s8 = inlined_call_operand.hbm [shape: f32[128,128], index: 8, kind: input, shape index: {}]   ;;  %s1101_s9 = inlined_call_operand.vmem [shape: f32[1,128], index: 9, kind: input, shape index: {}]   ;;  %s1102_s10 = inlined_call_operand.hbm [shape: f32[8,128], index: 10, kind: output, shape index: {}]  }
   0x1   :  { %16 = vsyncpa [#allocation6], 0 }
   0x2   :  { %17 = vsyncpa [#allocation9], 0 }
   0x3   :  { %18 = vsyncpa [#allocation12], 0 }
   0x4   :  { %19 = vsyncpa [#allocation4], 0  ;;  %s905_s13 = smov [#allocation5]  }
   0x5   :  { %s36_s14 = sshll.u32 %s905_s13, 4  ;;  %s37_s14 = int_to_ptr.vmem [resolvable:$true] %s36_s14 }
   0x6   :  { %s763_s15 = scalar_lea.vmem %s37_s14, 128  ;;  %p768_p1 = scmp.lt.s32.totalorder %s37_s14, %s37_s14 }
   0x7   :  { %p764_p0 = scmp.ne.s32.totalorder %s37_s14, %s763_s15  ;;  %p769_p2 = scmp.lt.s32.totalorder %s763_s15, %s763_s15 }
   0x9   :  { %p770_p3 = por %p769_p2, %p768_p1 }
   0xb   :  { %p771_p4 = pnand %p770_p3, %p764_p0 }
   0xd   :  { %774 = shalt.err (!%p771_p4)
}
   0xe   :  { %39 = dma.hbm_to_vmem [thread:$0]  %s1093_s1, 128, %s37_s14, [#allocation6]  }
   0xf   :  { %s906_s18 = smov [#allocation8]   ;;  %s907_s20 = smov [#allocation2]  }
  0x10   :  { %s59_s19 = sshll.u32 %s906_s18, 4  ;;  %s26_s21 = sshll.u32 %s907_s20, 4  ;;  %s60_s19 = int_to_ptr.vmem [resolvable:$true] %s59_s19  ;;  %s27_s21 = int_to_ptr.vmem [resolvable:$true] %s26_s21 }
  0x11   :  { %s783_s22 = scalar_lea.vmem %s60_s19, 2048  ;;  %p788_p6 = scmp.lt.s32.totalorder %s60_s19, %s60_s19 }
  0x12   :  { %p784_p5 = scmp.ne.s32.totalorder %s60_s19, %s783_s22  ;;  %p789_p7 = scmp.lt.s32.totalorder %s783_s22, %s783_s22 }
  0x14   :  { %p790_p8 = por %p789_p7, %p788_p6 }
  0x16   :  { %p791_p9 = pnand %p790_p8, %p784_p5 }
  0x18   :  { %794 = shalt.err (!%p791_p9)
}
  0x19   :  { %s908_s23 = smov 128   ;;  %s909_s24 = smov 8  }
  0x1a   :  { %65 = dma.hbm_to_vmem [thread:$0]  %s1096_s4, 2048, %s60_s19, [#allocation9], %s908_s23, %s908_s23, %s909_s24  }
  0x1b   :  { %s803_s1 = scalar_lea.vmem %s27_s21, 128  ;;  %p808_p11 = scmp.lt.s32.totalorder %s27_s21, %s27_s21 }
  0x1c   :  { %p804_p10 = scmp.ne.s32.totalorder %s27_s21, %s803_s1  ;;  %p809_p12 = scmp.lt.s32.totalorder %s803_s1, %s803_s1 }
  0x1e   :  { %p810_p13 = por %p809_p12, %p808_p11 }
  0x20   :  { %p811_p0 = pnand %p810_p13, %p804_p10 }
  0x22   :  { %814 = shalt.err (!%p811_p0)
}
  0x23   :  { %29 = dma.hbm_to_vmem [thread:$0]  %s1092_s0, 128, %s27_s21, [#allocation3]  }
  0x24   :  { %s910_s29 = smov [#allocation7]   ;;  %s911_s11 = smov [#allocation10]  }
  0x25   :  { %s45_s30 = sshll.u32 %s910_s29, 4  ;;  %s73_s12 = sshll.u32 %s911_s11, 4  ;;  %s46_s30 = int_to_ptr.vmem [resolvable:$true] %s45_s30  ;;  %s74_s12 = int_to_ptr.vmem [resolvable:$true] %s73_s12 }
  0x26   :  { %s823_s13 = scalar_lea.vmem %s46_s30, 2048  ;;  %p828_p2 = scmp.lt.s32.totalorder %s46_s30, %s46_s30 }
  0x27   :  { %p824_p1 = scmp.ne.s32.totalorder %s46_s30, %s823_s13  ;;  %p829_p3 = scmp.lt.s32.totalorder %s823_s13, %s823_s13 }
  0x29   :  { %p830_p4 = por %p829_p3, %p828_p2 }
  0x2b   :  { %p831_p5 = pnand %p830_p4, %p824_p1 }
  0x2d   :  { %834 = shalt.err (!%p831_p5)
}
  0x2e   :  { %51 = dma.hbm_to_vmem [thread:$0]  %s1094_s2, 2048, %s46_s30, [#allocation6], %s908_s23, %s908_s23, %s909_s24  }
  0x2f   :  { %s843_s0 = scalar_lea.vmem %s74_s12, 2048  ;;  %p848_p7 = scmp.lt.s32.totalorder %s74_s12, %s74_s12 }
  0x30   :  { %p844_p6 = scmp.ne.s32.totalorder %s74_s12, %s843_s0  ;;  %p849_p8 = scmp.lt.s32.totalorder %s843_s0, %s843_s0 }
  0x32   :  { %p850_p9 = por %p849_p8, %p848_p7 }
  0x34   :  { %p851_p10 = pnand %p850_p9, %p844_p6 }
  0x36   :  { %854 = shalt.err (!%p851_p10)
}
  0x37   :  { %79 = dma.hbm_to_vmem [thread:$0]  %s1098_s6, 2048, %s74_s12, [#allocation9], %s908_s23, %s908_s23, %s909_s24  }
  0x38   :  { %s912_s17 = smov [#allocation11]  }
  0x39   :  { %s87_s18 = sshll.u32 %s912_s17, 4  ;;  %s88_s18 = int_to_ptr.vmem [resolvable:$true] %s87_s18 }
  0x3a   :  { %s863_s19 = scalar_lea.vmem %s88_s18, 2048  ;;  %p868_p12 = scmp.lt.s32.totalorder %s88_s18, %s88_s18 }
  0x3b   :  { %p864_p11 = scmp.ne.s32.totalorder %s88_s18, %s863_s19  ;;  %p869_p13 = scmp.lt.s32.totalorder %s863_s19, %s863_s19 }
  0x3d   :  { %p870_p0 = por %p869_p13, %p868_p12 }
  0x3f   :  { %p871_p1 = pnand %p870_p0, %p864_p11 }
  0x41   :  { %874 = shalt.err (!%p871_p1)
}
  0x42   :  { %93 = dma.hbm_to_vmem [thread:$0]  %s1100_s8, 2048, %s88_s18, [#allocation12], %s908_s23, %s908_s23, %s909_s24  }
  0x43   :  { %895 = dma.done.wait [#allocation3], 128  }
  0x44   :  { %896 = vsyncadd [#allocation3], 4294967168 }
  0x45   :  { %897 = dma.done.wait [#allocation6], 2176  }
  0x46   :  { %898 = vsyncadd [#allocation6], 4294965120 }
  0x47   :  { %899 = dma.done.wait [#allocation9], 4096  }
  0x48   :  { %900 = vsyncadd [#allocation9], 4294963200 }
  0x49   :  { %901 = dma.done.wait [#allocation12], 2048  }
  0x4a   :  { %902 = vsyncadd [#allocation12], 4294965248  ;;  %v913_v0 = vmov 0.0   ;;  %vm914_vm0 = vmmov 0   ;;  %v130_v1 = vld [vmem:[#allocation7 + $0x78] sm:$0xff]  ;;  %v129_v2 = vld [vmem:[#allocation7 + $0x70] sm:$0xff] }
  0x4b   :  { %596 = vmatprep.subr.mxu0 %v913_v0  ;;  %628 = vmatprep.mubr.msk.f32.mxu0 %vm914_vm0, %v913_v0  ;;  %v128_v3 = vld [vmem:[#allocation7 + $0x68] sm:$0xff]  ;;  %v127_v4 = vld [vmem:[#allocation7 + $0x60] sm:$0xff]  ;;  %v126_v5 = vld [vmem:[#allocation7 + $0x58] sm:$0xff]  ;;  %s915_s25 = smov [#allocation13]  }
  0x4c   :  { %631 = vmatprep.subr.mxu1 %v913_v0  ;;  %663 = vmatprep.mubr.msk.f32.mxu1 %vm914_vm0, %v913_v0  ;;  %v125_v6 = vld [vmem:[#allocation7 + $0x50] sm:$0xff]  ;;  %v124_v7 = vld [vmem:[#allocation7 + $0x48] sm:$0xff]  ;;  %v123_v8 = vld [vmem:[#allocation7 + $0x40] sm:$0xff]  ;;  %s510_s26 = sshll.u32 %s915_s25, 4  ;;  %s511_s26 = int_to_ptr.vmem [resolvable:$true] %s510_s26 }
  0x4d   :  { %597 = vmatpush3.msra.mxu0 %v130_v1  ;;  %v122_v9 = vld [vmem:[#allocation7 + $0x38] sm:$0xff]  ;;  %v121_v10 = vld [vmem:[#allocation7 + $0x30] sm:$0xff]  ;;  %v120_v11 = vld [vmem:[#allocation7 + $0x28] sm:$0xff]  ;;  %p880_p3 = scmp.lt.s32.totalorder %s511_s26, %s511_s26 }
  0x4e   :  { %598 = vmatprep.subr.mxu0 %v913_v0  ;;  %v119_v12 = vld [vmem:[#allocation7 + $0x20] sm:$0xff]  ;;  %v118_v13 = vld [vmem:[#allocation7 + $0x18] sm:$0xff]  ;;  %v117_v14 = vld [vmem:[#allocation7 + $0x10] sm:$0xff] }
  0x4f   :  { %599 = vmatpush3.msra.mxu0 %v129_v2  ;;  %v116_v15 = vld [vmem:[#allocation7 + $0x8] sm:$0xff]  ;;  %v115_v16 = vld [vmem:[#allocation7] sm:$0xff]  ;;  %v1021_v17 = vld [vmem:[#allocation2] sm:$0xff] }
  0x50   :  { %600 = vmatprep.subr.mxu0 %v913_v0  ;;  %v230_v18 = vld [vmem:[#allocation8 + $0x78] sm:$0xff]  ;;  %v229_v19 = vld [vmem:[#allocation8 + $0x70] sm:$0xff]  ;;  %v228_v20 = vld [vmem:[#allocation8 + $0x68] sm:$0xff] }
  0x51   :  { %601 = vmatpush3.msra.mxu0 %v128_v3  ;;  %632 = vmatpush3.msra.mxu1 %v230_v18  ;;  %v227_v21 = vld [vmem:[#allocation8 + $0x60] sm:$0xff]  ;;  %v226_v22 = vld [vmem:[#allocation8 + $0x58] sm:$0xff]  ;;  %v225_v23 = vld [vmem:[#allocation8 + $0x50] sm:$0xff] }
  0x52   :  { %602 = vmatprep.subr.mxu0 %v913_v0  ;;  %633 = vmatprep.subr.mxu1 %v913_v0  ;;  %v224_v24 = vld [vmem:[#allocation8 + $0x48] sm:$0xff]  ;;  %v223_v25 = vld [vmem:[#allocation8 + $0x40] sm:$0xff]  ;;  %v222_v26 = vld [vmem:[#allocation8 + $0x38] sm:$0xff] }
  0x53   :  { %603 = vmatpush3.msra.mxu0 %v127_v4  ;;  %634 = vmatpush3.msra.mxu1 %v229_v19  ;;  %v221_v27 = vld [vmem:[#allocation8 + $0x30] sm:$0xff]  ;;  %v220_v28 = vld [vmem:[#allocation8 + $0x28] sm:$0xff]  ;;  %v219_v29 = vld [vmem:[#allocation8 + $0x20] sm:$0xff] }
  0x54   :  { %604 = vmatprep.subr.mxu0 %v913_v0  ;;  %635 = vmatprep.subr.mxu1 %v913_v0  ;;  %v218_v30 = vld [vmem:[#allocation8 + $0x18] sm:$0xff]  ;;  %v217_v31 = vld [vmem:[#allocation8 + $0x10] sm:$0xff]  ;;  %v216_v32 = vld [vmem:[#allocation8 + $0x8] sm:$0xff] }
  0x55   :  { %605 = vmatpush3.msra.mxu0 %v126_v5  ;;  %636 = vmatpush3.msra.mxu1 %v228_v20  ;;  %v215_v33 = vld [vmem:[#allocation8] sm:$0xff]  ;;  %v325_v34 = vld [vmem:[#allocation10 + $0x78] sm:$0xff]  ;;  %v324_v35 = vld [vmem:[#allocation10 + $0x70] sm:$0xff] }
  0x56   :  { %606 = vmatprep.subr.mxu0 %v913_v0  ;;  %637 = vmatprep.subr.mxu1 %v913_v0  ;;  %v323_v36 = vld [vmem:[#allocation10 + $0x68] sm:$0xff]  ;;  %v322_v37 = vld [vmem:[#allocation10 + $0x60] sm:$0xff]  ;;  %v321_v38 = vld [vmem:[#allocation10 + $0x58] sm:$0xff] }
  0x57   :  { %607 = vmatpush3.msra.mxu0 %v125_v6  ;;  %638 = vmatpush3.msra.mxu1 %v227_v21  ;;  %v320_v39 = vld [vmem:[#allocation10 + $0x50] sm:$0xff]  ;;  %v319_v40 = vld [vmem:[#allocation10 + $0x48] sm:$0xff]  ;;  %v318_v41 = vld [vmem:[#allocation10 + $0x40] sm:$0xff] }
  0x58   :  { %608 = vmatprep.subr.mxu0 %v913_v0  ;;  %639 = vmatprep.subr.mxu1 %v913_v0  ;;  %v317_v42 = vld [vmem:[#allocation10 + $0x38] sm:$0xff]  ;;  %v316_v43 = vld [vmem:[#allocation10 + $0x30] sm:$0xff]  ;;  %v315_v44 = vld [vmem:[#allocation10 + $0x28] sm:$0xff] }
  0x59   :  { %609 = vmatpush3.msra.mxu0 %v124_v7  ;;  %640 = vmatpush3.msra.mxu1 %v226_v22  ;;  %v314_v45 = vld [vmem:[#allocation10 + $0x20] sm:$0xff]  ;;  %v313_v46 = vld [vmem:[#allocation10 + $0x18] sm:$0xff]  ;;  %v522_v47 = vld [vmem:[%s1095_s3] ss:$0 sm:$0xff] }
  0x5a   :  { %610 = vmatprep.subr.mxu0 %v913_v0  ;;  %641 = vmatprep.subr.mxu1 %v913_v0  ;;  %v312_v56 = vld [vmem:[#allocation10 + $0x10] sm:$0xff]  ;;  %v311_v57 = vld [vmem:[#allocation10 + $0x8] sm:$0xff]  ;;  %v310_v58 = vld [vmem:[#allocation10] sm:$0xff] }
  0x5b   :  { %611 = vmatpush3.msra.mxu0 %v123_v8  ;;  %642 = vmatpush3.msra.mxu1 %v225_v23  ;;  %v524_v59 = vld [vmem:[%s1097_s5] ss:$0 sm:$0xff]  ;;  %v308_v61 = vld [vmem:[#allocation5] sm:$0xff]  ;;  %v423_v4 = vld [vmem:[#allocation11 + $0x68] sm:$0xff] }
  0x5c   :  { %612 = vmatprep.subr.mxu0 %v913_v0  ;;  %643 = vmatprep.subr.mxu1 %v913_v0  ;;  %v425_v2 = vld [vmem:[#allocation11 + $0x78] sm:$0xff]  ;;  %v424_v3 = vld [vmem:[#allocation11 + $0x70] sm:$0xff]  ;;  %v422_v5 = vld [vmem:[#allocation11 + $0x60] sm:$0xff] }
  0x5d   :  { %613 = vmatpush3.msra.mxu0 %v122_v9  ;;  %644 = vmatpush3.msra.mxu1 %v224_v24  ;;  %v421_v6 = vld [vmem:[#allocation11 + $0x58] sm:$0xff]  ;;  %v420_v7 = vld [vmem:[#allocation11 + $0x50] sm:$0xff]  ;;  %v419_v8 = vld [vmem:[#allocation11 + $0x48] sm:$0xff] }
  0x5e   :  { %614 = vmatprep.subr.mxu0 %v913_v0  ;;  %645 = vmatprep.subr.mxu1 %v913_v0  ;;  %v418_v9 = vld [vmem:[#allocation11 + $0x40] sm:$0xff]  ;;  %v525_v18 = vld [vmem:[%s1099_s7] ss:$0 sm:$0xff]  ;;  %s875_s7 = scalar_lea.vmem %s511_s26, 128 }
  0x5f   :  { %615 = vmatpush3.msra.mxu0 %v121_v10  ;;  %646 = vmatpush3.msra.mxu1 %v223_v25  ;;  %v417_v10 = vld [vmem:[#allocation11 + $0x38] sm:$0xff]  ;;  %p876_p2 = scmp.ne.s32.totalorder %s511_s26, %s875_s7  ;;  %p881_p4 = scmp.lt.s32.totalorder %s875_s7, %s875_s7 }
  0x60   :  { %616 = vmatprep.subr.mxu0 %v913_v0  ;;  %647 = vmatprep.subr.mxu1 %v913_v0 }
  0x61   :  { %617 = vmatpush3.msra.mxu0 %v120_v11  ;;  %648 = vmatpush3.msra.mxu1 %v222_v26  ;;  %v416_v11 = vld [vmem:[#allocation11 + $0x30] sm:$0xff]  ;;  %p882_p5 = por %p881_p4, %p880_p3 }
  0x62   :  { %618 = vmatprep.subr.mxu0 %v913_v0  ;;  %649 = vmatprep.subr.mxu1 %v913_v0 }
  0x63   :  { %619 = vmatpush3.msra.mxu0 %v119_v12  ;;  %650 = vmatpush3.msra.mxu1 %v221_v27  ;;  %v415_v12 = vld [vmem:[#allocation11 + $0x28] sm:$0xff]  ;;  %p883_p6 = pnand %p882_p5, %p876_p2 }
  0x64   :  { %620 = vmatprep.subr.mxu0 %v913_v0  ;;  %651 = vmatprep.subr.mxu1 %v913_v0 }
  0x65   :  { %621 = vmatpush3.msra.mxu0 %v118_v13  ;;  %652 = vmatpush3.msra.mxu1 %v220_v28  ;;  %v414_v13 = vld [vmem:[#allocation11 + $0x20] sm:$0xff] }
  0x66   :  { %622 = vmatprep.subr.mxu0 %v913_v0  ;;  %653 = vmatprep.subr.mxu1 %v913_v0 }
  0x67   :  { %623 = vmatpush3.msra.mxu0 %v117_v14  ;;  %654 = vmatpush3.msra.mxu1 %v219_v29  ;;  %v413_v14 = vld [vmem:[#allocation11 + $0x18] sm:$0xff] }
  0x68   :  { %624 = vmatprep.subr.mxu0 %v913_v0  ;;  %655 = vmatprep.subr.mxu1 %v913_v0 }
  0x69   :  { %625 = vmatpush3.msra.mxu0 %v116_v15  ;;  %656 = vmatpush3.msra.mxu1 %v218_v30  ;;  %v412_v15 = vld [vmem:[#allocation11 + $0x10] sm:$0xff] }
  0x6a   :  { %626 = vmatprep.subr.mxu0 %v913_v0  ;;  %657 = vmatprep.subr.mxu1 %v913_v0 }
  0x6b   :  { %627 = vmatpush3.msra.mxu0 %v115_v16  ;;  %658 = vmatpush3.msra.mxu1 %v217_v31  ;;  %v411_v16 = vld [vmem:[#allocation11 + $0x8] sm:$0xff] }
  0x6c   :  { %629 = vmatmul.mubr.f32.vlgmr.msra.gmra.mxu0 %v1021_v17  ;;  %666 = vmatprep.subr.mxu0 %v913_v0 }
  0x6d   :  { %698 = vmatprep.mubr.msk.f32.mxu0 %vm914_vm0, %v913_v0  ;;  %659 = vmatprep.subr.mxu1 %v913_v0 }
  0x6e   :  { %660 = vmatpush3.msra.mxu1 %v216_v32  ;;  %667 = vmatpush3.msra.mxu0 %v325_v34 }
  0x6f   :  { %661 = vmatprep.subr.mxu1 %v913_v0  ;;  %668 = vmatprep.subr.mxu0 %v913_v0 }
  0x70   :  { %662 = vmatpush3.msra.mxu1 %v215_v33  ;;  %669 = vmatpush3.msra.mxu0 %v324_v35 }
  0x71   :  { %701 = vmatprep.subr.mxu1 %v913_v0  ;;  %670 = vmatprep.subr.mxu0 %v913_v0 }
  0x72   :  { %671 = vmatpush3.msra.mxu0 %v323_v36 }
  0x73   :  { %672 = vmatprep.subr.mxu0 %v913_v0 }
  0x74   :  { %673 = vmatpush3.msra.mxu0 %v322_v37 }
  0x75   :  { %674 = vmatprep.subr.mxu0 %v913_v0 }
  0x76   :  { %675 = vmatpush3.msra.mxu0 %v321_v38 }
  0x77   :  { %676 = vmatprep.subr.mxu0 %v913_v0 }
  0x78   :  { %677 = vmatpush3.msra.mxu0 %v320_v39 }
  0x79   :  { %678 = vmatprep.subr.mxu0 %v913_v0 }
  0x7a   :  { %679 = vmatpush3.msra.mxu0 %v319_v40 }
  0x7b   :  { %680 = vmatprep.subr.mxu0 %v913_v0 }
  0x7c   :  { %681 = vmatpush3.msra.mxu0 %v318_v41 }
  0x7d   :  { %682 = vmatprep.subr.mxu0 %v913_v0 }
  0x7e   :  { %683 = vmatpush3.msra.mxu0 %v317_v42 }
  0x7f   :  { %684 = vmatprep.subr.mxu0 %v913_v0 }
  0x80   :  { %685 = vmatpush3.msra.mxu0 %v316_v43 }
  0x81   :  { %686 = vmatprep.subr.mxu0 %v913_v0 }
  0x82   :  { %687 = vmatpush3.msra.mxu0 %v315_v44 }
  0x83   :  { %688 = vmatprep.subr.mxu0 %v913_v0 }
  0x84   :  { %689 = vmatpush3.msra.mxu0 %v314_v45 }
  0x85   :  { %690 = vmatprep.subr.mxu0 %v913_v0 }
  0x86   :  { %691 = vmatpush3.msra.mxu0 %v313_v46 }
  0x87   :  { %692 = vmatprep.subr.mxu0 %v913_v0 }
  0x88   :  { %693 = vmatpush3.msra.mxu0 %v312_v56 }
  0x89   :  { %694 = vmatprep.subr.mxu0 %v913_v0 }
  0x8a   :  { %695 = vmatpush3.msra.mxu0 %v311_v57 }
  0x8b   :  { %696 = vmatprep.subr.mxu0 %v913_v0 }
  0x8c   :  { %697 = vmatpush3.msra.mxu0 %v310_v58 }
 0x12c   :  { %v204_v48 = vpop.f32.mrf.mxu0 }
 0x12d   :  { %v205_v49 = vadd.f32 %v522_v47, %v204_v48 }
 0x12e   :  { %v630_v50 = vpop.f32.mrf.mxu0 }
 0x12f   :  { %v523_v51 = vmul.f32 -1.442695, %v205_v49 }
 0x131   :  { %747 = vpow2.f32 %v523_v51 }
 0x13e   :  { %v748_v52 = vpop.eup %747 }
 0x13f   :  { %v211_v53 = vadd.f32 1.0, %v748_v52 }
 0x141   :  { %749 = vrcp.f32 %v211_v53 }
 0x14e   :  { %v750_v54 = vpop.eup %749 }
 0x14f   :  { %v214_v55 = vmul.f32 %v750_v54, %v1021_v17  ;;  %v410_v17 = vld [vmem:[#allocation11] sm:$0xff] }
 0x151   :  { %664 = vmatmul.mubr.f32.vlgmr.msra.gmra.mxu1 %v214_v55 }
 0x152   :  { %733 = vmatprep.mubr.msk.f32.mxu1 %vm914_vm0, %v913_v0  ;;  %702 = vmatpush3.msra.mxu1 %v425_v2 }
 0x153   :  { %703 = vmatprep.subr.mxu1 %v913_v0 }
 0x154   :  { %704 = vmatpush3.msra.mxu1 %v424_v3 }
 0x155   :  { %705 = vmatprep.subr.mxu1 %v913_v0 }
 0x156   :  { %706 = vmatpush3.msra.mxu1 %v423_v4 }
 0x157   :  { %707 = vmatprep.subr.mxu1 %v913_v0 }
 0x158   :  { %708 = vmatpush3.msra.mxu1 %v422_v5 }
 0x159   :  { %709 = vmatprep.subr.mxu1 %v913_v0 }
 0x15a   :  { %710 = vmatpush3.msra.mxu1 %v421_v6 }
 0x15b   :  { %711 = vmatprep.subr.mxu1 %v913_v0 }
 0x15c   :  { %712 = vmatpush3.msra.mxu1 %v420_v7 }
 0x15d   :  { %713 = vmatprep.subr.mxu1 %v913_v0 }
 0x15e   :  { %714 = vmatpush3.msra.mxu1 %v419_v8 }
 0x15f   :  { %715 = vmatprep.subr.mxu1 %v913_v0 }
 0x160   :  { %716 = vmatpush3.msra.mxu1 %v418_v9 }
 0x161   :  { %717 = vmatprep.subr.mxu1 %v913_v0 }
 0x162   :  { %718 = vmatpush3.msra.mxu1 %v417_v10 }
 0x163   :  { %719 = vmatprep.subr.mxu1 %v913_v0 }
 0x164   :  { %720 = vmatpush3.msra.mxu1 %v416_v11 }
 0x165   :  { %721 = vmatprep.subr.mxu1 %v913_v0 }
 0x166   :  { %722 = vmatpush3.msra.mxu1 %v415_v12 }
 0x167   :  { %723 = vmatprep.subr.mxu1 %v913_v0 }
 0x168   :  { %724 = vmatpush3.msra.mxu1 %v414_v13 }
 0x169   :  { %725 = vmatprep.subr.mxu1 %v913_v0 }
 0x16a   :  { %726 = vmatpush3.msra.mxu1 %v413_v14 }
 0x16b   :  { %727 = vmatprep.subr.mxu1 %v913_v0 }
 0x16c   :  { %728 = vmatpush3.msra.mxu1 %v412_v15 }
 0x16d   :  { %729 = vmatprep.subr.mxu1 %v913_v0 }
 0x16e   :  { %730 = vmatpush3.msra.mxu1 %v411_v16 }
 0x16f   :  { %731 = vmatprep.subr.mxu1 %v913_v0  ;;  %v527_v0 = vld [vmem:[%s1101_s9] ss:$0 sm:$0xff] }
 0x170   :  { %732 = vmatpush3.msra.mxu1 %v410_v17 }
 0x211   :  { %v304_v60 = vpop.f32.mrf.mxu1 }
 0x212   :  { %v305_v62 = vadd.f32 %v524_v59, %v304_v60 }
 0x213   :  { %v665_v63 = vpop.f32.mrf.mxu1 }
 0x214   :  { %v309_v1 = vadd.f32 %v308_v61, %v305_v62 }
 0x216   :  { %699 = vmatmul.mubr.f32.vlgmr.msra.gmra.mxu0 %v309_v1 }
 0x2d6   :  { %v399_v19 = vpop.f32.mrf.mxu0 }
 0x2d7   :  { %v400_v20 = vadd.f32 %v525_v18, %v399_v19 }
 0x2d8   :  { %v700_v21 = vpop.f32.mrf.mxu0 }
 0x2d9   :  { %v526_v22 = vmul.f32 -1.442695, %v400_v20 }
 0x2db   :  { %751 = vpow2.f32 %v526_v22 }
 0x2e8   :  { %v752_v23 = vpop.eup %751 }
 0x2e9   :  { %v406_v24 = vadd.f32 1.0, %v752_v23 }
 0x2eb   :  { %753 = vrcp.f32 %v406_v24 }
 0x2f8   :  { %v754_v25 = vpop.eup %753 }
 0x2f9   :  { %v409_v26 = vmul.f32 %v754_v25, %v309_v1 }
 0x2fb   :  { %734 = vmatmul.mubr.f32.vlgmr.msra.gmra.mxu1 %v409_v26 }
 0x3bb   :  { %v499_v27 = vpop.f32.mrf.mxu1 }
 0x3bc   :  { %v500_v28 = vadd.f32 %v527_v0, %v499_v27 }
 0x3bd   :  { %v735_v29 = vpop.f32.mrf.mxu1 }
 0x3be   :  { %503 = vst [vmem:[#allocation13] sm:$0xff] %v500_v28 }
 0x3bf   :  { %886 = shalt.err (!%p883_p6)
}
 0x3c0   :  { %513 = dma.vmem_to_hbm [thread:$0]  %s511_s26, 128, %s1102_s10, [#allocation4]  }
 0x3c1   :  { %903 = dma.done.wait [#allocation4], 128  }
 0x3c2   :  { %904 = vsyncadd [#allocation4], 4294967168 }
 0x3c3   :  { %517 = vsyncpa [#allocation3], 1 }
 0x3c4   :  { %518 = vsyncpa [#allocation6], 1 }
 0x3c5   :  { %519 = vsyncpa [#allocation9], 1 }
 0x3c6   :  { %520 = vsyncpa [#allocation12], 1 }
 0x3c7   :  { %521 = vsyncpa [#allocation4], 1 }

</bundles_post_ra>
